<compile_context>
chip_gen: v6e
topology: v6e:2x2x1
jax: 0.10.0
libtpu: 0.0.40
codegen_flags: <defaults>
</compile_context>

<pallas_src>
from typing import NamedTuple, Tuple

import jax
import jax.numpy as jnp
from jax.experimental import pallas as pl
from jax.experimental.pallas import tpu as pltpu


# ----------------------------- kernels -------------------------------------


def _make_avg_kernel(n_hidden: int, use_mxu: bool):
    """Masked-average kernel over a (batch, hidden, sequence) grid.

    Grid axes: (batch tiles, hidden tiles, sequence tiles).  The sequence axis
    is the reduction axis (innermost, "arbitrary"); partial sums accumulate in
    an f32 VMEM scratch and are scaled/cast/stored on the last sequence step.
    """

    def kernel(m_ref, inv_ref, *refs):
        h_refs = refs[:n_hidden]
        o_ref = refs[n_hidden]
        acc_ref = refs[n_hidden + 1]
        s = pl.program_id(2)

        @pl.when(s == 0)
        def _init():
            acc_ref[...] = jnp.zeros_like(acc_ref)

        if use_mxu:
            # m_ref: (TB, 1, TS) lane-dense mask in the activation dtype.
            m = m_ref[...]
            part = jnp.einsum("bqs,bsh->bqh", m, h_refs[0][...],
                              preferred_element_type=jnp.float32)
            for hr in h_refs[1:]:
                part = part + jnp.einsum("bqs,bsh->bqh", m, hr[...],
                                         preferred_element_type=jnp.float32)
            acc_ref[...] += part[:, 0, :]
        else:
            # m_ref: (TB, TS, 1) sublane-dense f32 mask; VPU multiply + sublane
            # reduce with f32 accumulation (preferred on v5e for f32 inputs).
            m = m_ref[...]
            part = (h_refs[0][...].astype(jnp.float32) * m).sum(axis=1)
            for hr in h_refs[1:]:
                part = part + (hr[...].astype(jnp.float32) * m).sum(axis=1)
            acc_ref[...] += part

        @pl.when(s == pl.num_programs(2) - 1)
        def _finalize():
            # inv_ref: (TB, 1) f32 = (1/n_layers) / sum(mask)  (broadcast on lanes)
            o_ref[...] = (acc_ref[...] * inv_ref[...]).astype(o_ref.dtype)

    return kernel


# ----------------------------- tiling ---------------------------------------


_VMEM_LIMIT = 32 << 20        # explicit scoped-VMEM limit (safe on v5e/v6e/v7x)
_WORKSET_BUDGET = 24 << 20    # target double-buffered working set


def _round_up(x: int, m: int) -> int:
    return ((x + m - 1) // m) * m


def _workset_bytes(TB, TS, TH, itemsize, n_hidden, use_mxu):
    """Conservative per-step VMEM working set (double-buffered pipeline)."""
    ts_pad = _round_up(TS, 8)
    th_pad = _round_up(TH, 128)
    h_blk = TB * ts_pad * th_pad * itemsize
    if use_mxu:
        m_blk = TB * 8 * _round_up(TS, 128) * itemsize   # (TB, 1, TS)
        extra = 0
    else:
        m_blk = TB * ts_pad * 128 * 4                    # (TB, TS, 1) lane-padded
        # Headroom for the f32 (h * m) intermediate before the sublane reduce.
        extra = TB * ts_pad * th_pad * 4
    inv_blk = _round_up(TB, 8) * 128 * 4
    out_blk = _round_up(TB, 8) * th_pad * itemsize
    acc_blk = _round_up(TB, 8) * th_pad * 4
    return 2 * (n_hidden * h_blk + m_blk + inv_blk + out_blk) + acc_blk + extra


def _pick_tiles(B, S, H, itemsize, n_hidden, use_mxu):
    TB = 8 if B > 8 else B

    if H % 128 != 0:
        ths = [H]                 # non-128-aligned H must take the full-dim block
    else:
        cap = H
        if B <= 8 and H % 256 == 0:
            cap = H // 2          # keep >= 2 parallel grid steps (v7x dual-TC)
        ths = sorted({c for c in (cap, 1024, 512, 256, 128) if c <= cap},
                     reverse=True)

    # Sequence tiles: full S, else divisors of S (so no ragged boundary blocks).
    # The MXU-path mask block (TB, 1, TS) needs a 128-aligned lane dim.
    step = 128 if use_mxu else 8
    tss = [S] + sorted({t for t in range(step, S, step) if S % t == 0},
                       reverse=True)

    for th in ths:
        for ts in tss:
            if _workset_bytes(TB, ts, th, itemsize, n_hidden, use_mxu) <= _WORKSET_BUDGET:
                return TB, ts, th
    return TB, tss[-1], ths[-1]   # fallback (see TODO at top of file)


# ----------------------------- wrapper --------------------------------------


class ModelOutputs(NamedTuple):
    last_hidden_state: jax.Array          # (B, S, H)
    pooler_output: jax.Array              # (B, H)  (unused by these poolers)
    hidden_states: Tuple[jax.Array, ...]  # each (B, S, H)


_POOLER_TYPES = ("cls", "cls_before_pooler", "avg", "avg_top2", "avg_first_last")


def pooler_forward(pooler_type: str, attention_mask: jax.Array,
                   outputs: ModelOutputs, *, force_path=None) -> jax.Array:
    assert pooler_type in _POOLER_TYPES, f"unrecognized pooling type {pooler_type}"
    assert force_path in (None, "mxu", "vpu")

    last_hidden = outputs.last_hidden_state
    hidden_states = outputs.hidden_states

    if pooler_type in ("cls", "cls_before_pooler"):
        # Per review: a single strided copy of B*H elements — XLA does this
        # optimally; a Pallas call would over-fetch and add launch overhead.
        return last_hidden[:, 0, :]

    B, S, H = last_hidden.shape
    dtype = last_hidden.dtype
    itemsize = jnp.dtype(dtype).itemsize

    if pooler_type == "avg":
        hs = (last_hidden,)
    elif pooler_type == "avg_first_last":
        hs = (hidden_states[0], hidden_states[-1])
    else:  # avg_top2
        hs = (hidden_states[-1], hidden_states[-2])
    n_hidden = len(hs)

    if force_path is None:
        use_mxu = dtype != jnp.float32   # f32 -> VPU path; bf16/others -> MXU einsum
    else:
        use_mxu = force_path == "mxu"

    TB, TS, TH = _pick_tiles(B, S, H, itemsize, n_hidden, use_mxu)
    grid = (pl.cdiv(B, TB), pl.cdiv(H, TH), pl.cdiv(S, TS))

    # (1/n_layers) / sum(mask): removes the in-kernel reduction/divide and the
    # separate 0.5 multiply of the two-layer means.  (sum==0 -> Inf, as in ref.)
    counts = attention_mask.astype(jnp.float32).sum(axis=-1, keepdims=True)
    inv_den = (1.0 / n_hidden) / counts                                    # (B, 1) f32

    if use_mxu:
        mask3 = attention_mask.astype(dtype).reshape(B, 1, S)              # lane-dense
        m_spec = pl.BlockSpec((TB, 1, TS), lambda b, j, s: (b, 0, s))
        mask_bytes = B * S * itemsize
    else:
        mask3 = attention_mask.astype(jnp.float32).reshape(B, S, 1)        # sublane-dense
        m_spec = pl.BlockSpec((TB, TS, 1), lambda b, j, s: (b, s, 0))
        mask_bytes = B * S * 4

    inv_spec = pl.BlockSpec((TB, 1), lambda b, j, s: (b, 0))
    h_spec = pl.BlockSpec((TB, TS, TH), lambda b, j, s: (b, s, j))
    o_spec = pl.BlockSpec((TB, TH), lambda b, j, s: (b, j))

    cost = pl.CostEstimate(
        flops=2 * n_hidden * B * S * H + B * H,
        transcendentals=0,
        bytes_accessed=n_hidden * B * S * H * itemsize + mask_bytes
                       + B * 4 + B * H * itemsize,
    )
    cparams = pltpu.CompilerParams(
        dimension_semantics=("parallel", "parallel", "arbitrary"),
        vmem_limit_bytes=_VMEM_LIMIT,
    )

    return pl.pallas_call(
        _make_avg_kernel(n_hidden, use_mxu),
        out_shape=jax.ShapeDtypeStruct((B, H), dtype),
        grid=grid,
        in_specs=[m_spec, inv_spec] + [h_spec] * n_hidden,
        out_specs=o_spec,
        scratch_shapes=[pltpu.VMEM((TB, TH), jnp.float32)],
        compiler_params=cparams,
        cost_estimate=cost,
    )(mask3, inv_den, *hs)


# --------------------------- pure-JAX reference ------------------------------


def pooler_reference(pooler_type, attention_mask, outputs):
    last_hidden = outputs.last_hidden_state
    hidden_states = outputs.hidden_states
    am = attention_mask.astype(last_hidden.dtype)
    if pooler_type in ("cls", "cls_before_pooler"):
        return last_hidden[:, 0]
    if pooler_type == "avg":
        return (last_hidden * am[..., None]).sum(1) / am.sum(-1)[..., None]
    if pooler_type == "avg_first_last":
        h = (hidden_states[0] + hidden_states[-1]) / 2.0
        return (h * am[..., None]).sum(1) / am.sum(-1)[..., None]
    if pooler_type == "avg_top2":
        h = (hidden_states[-1] + hidden_states[-2]) / 2.0
        return (h * am[..., None]).sum(1) / am.sum(-1)[..., None]
    raise NotImplementedError


# ------------------------------- main ----------------------------------------


if __name__ == "__main__":
    def build(B, S, H, L, seed=0):
        key = jax.random.PRNGKey(seed)
        k_hs, k_pool, k_len = jax.random.split(key, 3)
        hidden_states = tuple(
            jax.random.normal(jax.random.fold_in(k_hs, i), (B, S, H), dtype=jnp.float32)
            for i in range(L))
        last_hidden = hidden_states[-1]
        pooler_output = jax.random.normal(k_pool, (B, H), dtype=jnp.float32)
        lens = 1 + jax.random.randint(k_len, (B,), 0, S)      # ragged lens in [1, S]
        attention_mask = (jnp.arange(S)[None, :] < lens[:, None]).astype(jnp.int32)
        return attention_mask, ModelOutputs(last_hidden, pooler_output, hidden_states)

    # Small shapes consistent with the module: batch=2, seq=8, hidden=32, 4 layers.
    am, outs = build(2, 8, 32, 4)
    for ptype in _POOLER_TYPES:
        got = jax.block_until_ready(pooler_forward(ptype, am, outs))
        want = pooler_reference(ptype, am, outs)
        assert got.shape == want.shape, (ptype, got.shape, want.shape)
        assert jnp.allclose(got, want, atol=1e-5, rtol=1e-5), ptype

    # Exercise the MXU (einsum) path that bf16 inputs would take, on f32 data.
    for ptype in ("avg", "avg_first_last"):
        got = jax.block_until_ready(pooler_forward(ptype, am, outs, force_path="mxu"))
        want = pooler_reference(ptype, am, outs)
        assert jnp.allclose(got, want, atol=1e-5, rtol=1e-5), ("mxu", ptype)

    # Non-multiple batch -> partial trailing batch block (review correctness item).
    am2, outs2 = build(10, 8, 32, 2, seed=1)
    got = jax.block_until_ready(pooler_forward("avg", am2, outs2))
    want = pooler_reference("avg", am2, outs2)
    assert jnp.allclose(got, want, atol=1e-5, rtol=1e-5), "avg, B=10"

    print("KERNEL_OK")
</pallas_src>

<mosaic_0001>
module attributes {stable_mosaic.version = 11 : i64} {
  func.func @kernel(%arg0: i32, %arg1: i32, %arg2: i32, %arg3: memref<2x8x1xf32, #tpu.memory_space<vmem>>, %arg4: memref<2x1xf32, #tpu.memory_space<vmem>>, %arg5: memref<2x8x32xf32, #tpu.memory_space<vmem>>, %arg6: memref<2x32xf32, #tpu.memory_space<vmem>>, %arg7: memref<2x32xf32, #tpu.memory_space<vmem>>) attributes {dimension_semantics = [#tpu.dimension_semantics<parallel>, #tpu.dimension_semantics<parallel>, #tpu.dimension_semantics<arbitrary>], iteration_bounds = array<i64: 1, 1, 1>, scalar_prefetch = 0 : i64, scratch_operands = 1 : i64, tpu.core_type = #tpu.core_type<tc>, window_params = [{transform_indices = @transform_0, window_bounds = array<i64: 2, 8, 1>}, {transform_indices = @transform_1, window_bounds = array<i64: 2, 1>}, {transform_indices = @transform_2, window_bounds = array<i64: 2, 8, 32>}, {transform_indices = @transform_3, window_bounds = array<i64: 2, 32>}]} {
    %c0_i32 = arith.constant 0 : i32
    %0 = arith.cmpi eq, %arg2, %c0_i32 : i32
    %1 = arith.extui %0 : i1 to i32
    %c0_i32_0 = arith.constant 0 : i32
    %2 = arith.cmpi ne, %1, %c0_i32_0 : i32
    scf.if %2 {
      %cst_12 = arith.constant 0.000000e+00 : f32
      %14 = vector.broadcast %cst_12 : f32 to vector<2x32xf32>
      %c0_13 = arith.constant 0 : index
      %c0_14 = arith.constant 0 : index
      %15 = vector.load %arg7[%c0_13, %c0_14] : memref<2x32xf32, #tpu.memory_space<vmem>>, vector<2x32xf32>
      tpu.vector_store %arg7[%c0_13, %c0_14], %14 {strides = array<i32>} : memref<2x32xf32, #tpu.memory_space<vmem>>, vector<2x32xf32>,
    } else {
    }
    %c0 = arith.constant 0 : index
    %c0_1 = arith.constant 0 : index
    %c0_2 = arith.constant 0 : index
    %3 = vector.load %arg3[%c0, %c0_1, %c0_2] : memref<2x8x1xf32, #tpu.memory_space<vmem>>, vector<2x8x1xf32>
    %c0_3 = arith.constant 0 : index
    %c0_4 = arith.constant 0 : index
    %c0_5 = arith.constant 0 : index
    %4 = vector.load %arg5[%c0_3, %c0_4, %c0_5] : memref<2x8x32xf32, #tpu.memory_space<vmem>>, vector<2x8x32xf32>
    %5 = vector.broadcast %3 : vector<2x8x1xf32> to vector<2x8x32xf32>
    %6 = arith.mulf %4, %5 : vector<2x8x32xf32>
    %cst = arith.constant dense<0.000000e+00> : vector<2x32xf32>
    %7 = vector.multi_reduction <add>, %6, %cst [1] : vector<2x8x32xf32> to vector<2x32xf32>
    %c0_6 = arith.constant 0 : index
    %c0_7 = arith.constant 0 : index
    %8 = vector.load %arg7[%c0_6, %c0_7] : memref<2x32xf32, #tpu.memory_space<vmem>>, vector<2x32xf32>
    %9 = arith.addf %8, %7 : vector<2x32xf32>
    %c0_8 = arith.constant 0 : index
    %c0_9 = arith.constant 0 : index
    %10 = vector.load %arg7[%c0_8, %c0_9] : memref<2x32xf32, #tpu.memory_space<vmem>>, vector<2x32xf32>
    tpu.vector_store %arg7[%c0_8, %c0_9], %9 {strides = array<i32>} : memref<2x32xf32, #tpu.memory_space<vmem>>, vector<2x32xf32>,
    %c0_i32_10 = arith.constant 0 : i32
    %11 = arith.cmpi eq, %arg2, %c0_i32_10 : i32
    %12 = arith.extui %11 : i1 to i32
    %c0_i32_11 = arith.constant 0 : i32
    %13 = arith.cmpi ne, %12, %c0_i32_11 : i32
    scf.if %13 {
      %c0_12 = arith.constant 0 : index
      %c0_13 = arith.constant 0 : index
      %14 = vector.load %arg7[%c0_12, %c0_13] : memref<2x32xf32, #tpu.memory_space<vmem>>, vector<2x32xf32>
      %c0_14 = arith.constant 0 : index
      %c0_15 = arith.constant 0 : index
      %15 = vector.load %arg4[%c0_14, %c0_15] : memref<2x1xf32, #tpu.memory_space<vmem>>, vector<2x1xf32>
      %16 = vector.broadcast %15 : vector<2x1xf32> to vector<2x32xf32>
      %17 = arith.mulf %14, %16 : vector<2x32xf32>
      %c0_16 = arith.constant 0 : index
      %c0_17 = arith.constant 0 : index
      %18 = vector.load %arg6[%c0_16, %c0_17] : memref<2x32xf32, #tpu.memory_space<vmem>>, vector<2x32xf32>
      tpu.vector_store %arg6[%c0_16, %c0_17], %17 {strides = array<i32>} : memref<2x32xf32, #tpu.memory_space<vmem>>, vector<2x32xf32>,
    } else {
    }
    return
  }
  func.func @transform_0(%arg0: i32, %arg1: i32, %arg2: i32) -> (i32, i32, i32) {
    %c0_i32 = arith.constant 0 : i32
    %c0_i32_0 = arith.constant 0 : i32
    return %arg0, %arg2, %c0_i32 : i32, i32, i32
  }
  func.func @transform_1(%arg0: i32, %arg1: i32, %arg2: i32) -> (i32, i32) {
    %c0_i32 = arith.constant 0 : i32
    %c0_i32_0 = arith.constant 0 : i32
    return %arg0, %c0_i32 : i32, i32
  }
  func.func @transform_2(%arg0: i32, %arg1: i32, %arg2: i32) -> (i32, i32, i32) {
    %c0_i32 = arith.constant 0 : i32
    return %arg0, %arg2, %arg1 : i32, i32, i32
  }
  func.func @transform_3(%arg0: i32, %arg1: i32, %arg2: i32) -> (i32, i32) {
    %c0_i32 = arith.constant 0 : i32
    return %arg0, %arg1 : i32, i32
  }
}

</mosaic_0001>

<bundles_post_ra>
// kernel: tpu_custom_call.1
= control target key start
LH: loop header
LB: loop body
LE: loop exit
PB: predicated region body
PF: predicated region fallthrough
CT: control target
= control target key end

     0   :  { %v114_v2 = vmov 0   ;;  %s158_s0 = inlined_call_operand.vmem [shape: f32[2,8,1], index: 0, kind: input, shape index: {}]   ;;  %s159_s1 = inlined_call_operand.vmem [shape: f32[2,1], index: 1, kind: input, shape index: {}]   ;;  %s160_s2 = inlined_call_operand.vmem [shape: f32[2,8,32], index: 2, kind: input, shape index: {}]   ;;  %s161_s3 = inlined_call_operand.hbm [shape: f32[2,32], index: 3, kind: output, shape index: {}]  }
   0x1   :  { %v21_v0 = vld [vmem:[%s158_s0] sm:$0xff]  ;;  %90 = vset.pattern.permute.xlu0 %v114_v2  ;;  %91 = vset.pattern.permute.xlu1 %v114_v2 }
   0x2   :  { %v65_v1 = vld [vmem:[%s159_s1] sm:$0x3] }
   0x3   :  { %8 = vsyncpa [#allocation4], 0  ;;  %27 = vperm.xlu0 %90, %v21_v0   ;;  %68 = vperm.xlu1 %91, %v65_v1   ;;  %v22_v3 = vld [vmem:[%s158_s0 + $0x8] sm:$0xff]  ;;  %vm19_vm0 = vcmask 254976   ;;  %v115_v4 = vmov 0.0   ;;  %v23_v5 = vld [vmem:[%s160_s2] sm:$0xff] }
   0x4   :  { %20 = vst.msk [vmem:[#allocation2] sm:$0x3] %vm19_vm0, %v115_v4  ;;  %vm37_vm1 = vcmask 261120   ;;  %v24_v8 = vld [vmem:[%s160_s2 + $0x8] sm:$0xff]  ;;  %vm55_vm2 = vcmask 1041409   ;;  %s116_s0 = smov [#allocation3]  }
   0x5   :  { %s79_s2 = sshll.u32 %s116_s0, 4  ;;  %s80_s2 = int_to_ptr.vmem [resolvable:$true] %s79_s2 }
   0x6   :  { %s92_s21 = scalar_lea.vmem %s80_s2, 32  ;;  %p97_p1 = scmp.lt.s32.totalorder %s80_s2, %s80_s2 }
   0x7   :  { %32 = vperm.xlu0 %90, %v22_v3   ;;  %p93_p0 = scmp.ne.s32.totalorder %s80_s2, %s92_s21  ;;  %p98_p2 = scmp.lt.s32.totalorder %s92_s21, %s92_s21 }
   0x9   :  { %p99_p3 = por %p98_p2, %p97_p1 }
   0xb   :  { %v52_v25 = vld [vmem:[#allocation2] sm:$0x3]  ;;  %p100_p4 = pnand %p99_p3, %p93_p0 }
  0x7e   :  { %v28_v6 = vpop.permute.xlu0 %27  ;;  %v69_v28 = vpop.permute.xlu1 %68 }
  0x7f   :  { %v35_v7 = vmul.f32 %v28_v6, %v23_v5 }
  0x81   :  { %v38_v9 = vsel %vm37_vm1, %v35_v7, 0.0 }
  0x82   :  { %v39_v10 = vrot.slane %v38_v9, 4  ;;  %v33_v11 = vpop.permute.xlu0 %32 }
  0x83   :  { %v36_v12 = vmul.f32 %v33_v11, %v24_v8 }
  0x84   :  { %v40_v13 = vadd.f32 %v39_v10, %v38_v9 }
  0x85   :  { %v45_v14 = vsel %vm37_vm1, %v36_v12, 0.0 }
  0x86   :  { %v41_v15 = vrot.slane %v40_v13, 2  ;;  %v46_v16 = vrot.slane %v45_v14, 4 }
  0x88   :  { %v42_v17 = vadd.f32 %v41_v15, %v40_v13  ;;  %v47_v18 = vadd.f32 %v46_v16, %v45_v14 }
  0x8a   :  { %v48_v19 = vrot.slane %v47_v18, 2  ;;  %v43_v20 = vrot.slane %v42_v17, 1 }
  0x8c   :  { %v49_v21 = vadd.f32 %v48_v19, %v47_v18  ;;  %v44_v23 = vadd.f32 %v43_v20, %v42_v17 }
  0x8e   :  { %v50_v22 = vrot.slane %v49_v21, 1 }
  0x90   :  { %v51_v24 = vadd.f32 %v50_v22, %v49_v21 }
  0x92   :  { %v56_v26 = vsel %vm55_vm2, %v51_v24, %v44_v23 }
  0x93   :  { %v58_v27 = vadd.f32 %v56_v26, %v52_v25 }
  0x95   :  { %60 = vst.msk [vmem:[#allocation2] sm:$0x3] %vm19_vm0, %v58_v27 }
  0x9c   :  { %v64_v29 = vld [vmem:[#allocation2] sm:$0x3] }
  0x9d   :  { %v71_v30 = vmul.f32 %v69_v28, %v64_v29 }
  0x9f   :  { %72 = vst.msk [vmem:[#allocation3] sm:$0x3] %vm19_vm0, %v71_v30 }
  0xa0   :  { %103 = shalt.err (!%p100_p4)
}
  0xa1   :  { %82 = dma.vmem_to_hbm [thread:$0]  %s80_s2, 32, %s161_s3, [#allocation4]  }
  0xa2   :  { %112 = dma.done.wait [#allocation4], 32  }
  0xa3   :  { %113 = vsyncadd [#allocation4], 4294967264 }
  0xa4   :  { %86 = vsyncpa [#allocation4], 1 }

</bundles_post_ra>
